<compile_context>
chip_gen: v6e
topology: v6e:2x2x1
jax: 0.10.0
libtpu: 0.0.40
codegen_flags: <defaults>
</compile_context>

<pallas_src>
import functools

import jax
import jax.numpy as jnp
from jax import lax
from jax.experimental import pallas as pl
from jax.experimental.pallas import tpu as pltpu


def fire_kernel(x_ref, wsq_ref, bsq_ref, wex_ref, bex_ref, mask_ref,
                out_ref, col_ref, *, H, W, Csq):
    # x_ref   : (1, Cin, M) bf16      M = H*W (lane axis)
    # wsq_ref : (Csq, Cin)  bf16      bsq_ref : (Csq, 1) f32
    # wex_ref : (Cout, 9*Csq) bf16    bex_ref : (Cout, 1) f32
    #           (expand1x1 weights fused into the center-tap columns)
    # mask_ref: (9, M) f32  precomputed 3x3 boundary masks, tap order (ky,kx)
    # out_ref : (1, Cout, M) f32
    # col_ref : (9*Csq, M) bf16 VMEM scratch (im2col buffer)
    M = H * W

    x = x_ref[0]                                            # (Cin, M) bf16

    # --- squeeze 1x1 conv + ReLU (bf16 MXU, f32 accumulate / bias / ReLU) ---
    s = jnp.dot(wsq_ref[...], x, preferred_element_type=jnp.float32)
    s = jnp.maximum(s + bsq_ref[...], 0.0)                  # (Csq, M) f32

    # --- im2col along the lane axis -----------------------------------------
    # For each of the 9 taps, rotate s by the flat offset dy*W+dx (XLU lane
    # rotate), apply the precomputed boundary mask, and store the bf16 result
    # straight into the col scratch (8-aligned row slices when Csq % 8 == 0).
    t = 0
    for dy in (-1, 0, 1):
        for dx in (-1, 0, 1):
            d = dy * W + dx
            if d == 0:
                tap = s                                     # center tap: mask is all ones
            else:
                tap = pltpu.roll(s, (-d) % M, 1) * mask_ref[t:t + 1, :]
            col_ref[t * Csq:(t + 1) * Csq, :] = tap.astype(jnp.bfloat16)
            t += 1

    # --- fused expand (1x1 + 3x3) conv + ReLU -> whole output block ---------
    e = jnp.dot(wex_ref[...], col_ref[...], preferred_element_type=jnp.float32)
    out_ref[0, :, :] = jnp.maximum(e + bex_ref[...], 0.0)


def fire_forward(x_nchw, wsq_oihw, bsq, w1_oihw, b1, w3_oihw, b3):
    """Fire forward pass.

    x_nchw   : (N, Cin, H, W) float32
    wsq_oihw : (Csq, Cin, 1, 1)   bsq : (Csq,)
    w1_oihw  : (Ce1, Csq, 1, 1)   b1  : (Ce1,)
    w3_oihw  : (Ce3, Csq, 3, 3)   b3  : (Ce3,)
    returns  : (N, Ce1+Ce3, H, W) float32
    """
    N, Cin, H, W = x_nchw.shape
    Csq = wsq_oihw.shape[0]
    Ce1 = w1_oihw.shape[0]
    Ce3 = w3_oihw.shape[0]
    Cout = Ce1 + Ce3
    M = H * W

    # Free reshape (merges trailing dims of contiguous NCHW) + bf16 cast so
    # the kernel's input DMA moves half the bytes.
    x_flat = x_nchw.reshape(N, Cin, M).astype(jnp.bfloat16)

    # One-time weight layout transforms (tiny, outside the kernel).
    wsq_k = wsq_oihw.reshape(Csq, Cin).astype(jnp.bfloat16)
    # 3x3 weights with K ordered (ky, kx, c), matching the im2col tap order.
    w3_k = jnp.transpose(w3_oihw, (0, 2, 3, 1)).reshape(Ce3, 9 * Csq)
    # Fuse expand1x1: its weights occupy the center-tap (t=4) columns of a
    # combined (Cout, 9*Csq) matrix; the rest of its row is zero.
    w1_pad = jnp.zeros((Ce1, 9 * Csq), jnp.float32)
    w1_pad = w1_pad.at[:, 4 * Csq:5 * Csq].set(w1_oihw.reshape(Ce1, Csq))
    wex_k = jnp.concatenate([w1_pad, w3_k], axis=0).astype(jnp.bfloat16)

    bsq_k = bsq.reshape(Csq, 1).astype(jnp.float32)
    bex_k = jnp.concatenate([b1, b3]).reshape(Cout, 1).astype(jnp.float32)

    # Precomputed 3x3 boundary masks (position-only; no per-image iota /
    # int div / mod / compares inside the kernel).
    pos = jnp.arange(M, dtype=jnp.int32)
    yy, xx = pos // W, pos % W
    masks = []
    for dy in (-1, 0, 1):
        for dx in (-1, 0, 1):
            masks.append((yy + dy >= 0) & (yy + dy < H) &
                         (xx + dx >= 0) & (xx + dx < W))
    mask9 = jnp.stack(masks).astype(jnp.float32)            # (9, M)

    def const_spec(shape):
        # Whole (tiny) parameter resident in VMEM; same block every step.
        return pl.BlockSpec(shape, lambda n: tuple(0 for _ in shape))

    kernel = functools.partial(fire_kernel, H=H, W=W, Csq=Csq)

    # VMEM budget: double-buffered x/out blocks + resident params + scratch.
    blk_bytes = (2 * (Cin * M * 2) + 2 * (Cout * M * 4) +
                 wsq_k.size * 2 + wex_k.size * 2 + mask9.size * 4 +
                 (Csq + Cout) * 4 + 9 * Csq * M * 2)
    vmem_limit = int(min(48 << 20, max(2 * blk_bytes + (4 << 20), 16 << 20)))

    flops = 2 * N * M * (Csq * Cin + Cout * 9 * Csq)
    bytes_accessed = (x_flat.size * 2 + N * Cout * M * 4 +
                      wsq_k.size * 2 + wex_k.size * 2 + mask9.size * 4 +
                      (Csq + Cout) * 4)

    out_flat = pl.pallas_call(
        kernel,
        out_shape=jax.ShapeDtypeStruct((N, Cout, M), jnp.float32),
        grid=(N,),
        in_specs=[
            pl.BlockSpec((1, Cin, M), lambda n: (n, 0, 0)),
            const_spec(wsq_k.shape),
            const_spec(bsq_k.shape),
            const_spec(wex_k.shape),
            const_spec(bex_k.shape),
            const_spec(mask9.shape),
        ],
        out_specs=pl.BlockSpec((1, Cout, M), lambda n: (n, 0, 0)),
        scratch_shapes=[pltpu.VMEM((9 * Csq, M), jnp.bfloat16)],
        compiler_params=pltpu.CompilerParams(
            dimension_semantics=("parallel",),
            vmem_limit_bytes=vmem_limit),
        cost_estimate=pl.CostEstimate(
            flops=flops, transcendentals=0, bytes_accessed=bytes_accessed),
    )(x_flat, wsq_k, bsq_k, wex_k, bex_k, mask9)

    # Free reshape back to NCHW.
    return out_flat.reshape(N, Cout, H, W)
    # TODO(synk): for deep Fire layers with tiny spatial maps (13x13 / 27x27),
    # fold a few images per grid step into the lane axis (and pad M to a
    # multiple of 128) to keep the 256-wide MXU fed; not needed at H=W=16.


def _reference_fire(x_nchw, wsq_oihw, bsq, w1_oihw, b1, w3_oihw, b3):
    """Pure-JAX f32 reference matching PyTorch Conv2d semantics (NCHW/OIHW)."""
    dn = ("NCHW", "OIHW", "NCHW")
    s = lax.conv_general_dilated(x_nchw, wsq_oihw, (1, 1), "VALID",
                                 dimension_numbers=dn)
    s = jax.nn.relu(s + bsq.reshape(1, -1, 1, 1))
    e1 = lax.conv_general_dilated(s, w1_oihw, (1, 1), "VALID",
                                  dimension_numbers=dn)
    e1 = jax.nn.relu(e1 + b1.reshape(1, -1, 1, 1))
    e3 = lax.conv_general_dilated(s, w3_oihw, (1, 1), ((1, 1), (1, 1)),
                                  dimension_numbers=dn)
    e3 = jax.nn.relu(e3 + b3.reshape(1, -1, 1, 1))
    return jnp.concatenate([e1, e3], axis=1)


if __name__ == "__main__":
    # Fire(inplanes=4, squeeze_planes=8, expand1x1_planes=8, expand3x3_planes=8)
    N, Cin, H, W = 2, 4, 16, 16
    Csq, Ce1, Ce3 = 8, 8, 8

    key = jax.random.PRNGKey(0)
    kx, k1, k2, k3, k4, k5, k6 = jax.random.split(key, 7)

    x = jax.random.normal(kx, (N, Cin, H, W), dtype=jnp.float32)

    # Parameters in PyTorch-native layouts (OIHW weights, 1-D biases).
    wsq = 0.1 * jax.random.normal(k1, (Csq, Cin, 1, 1), dtype=jnp.float32)
    bsq = 0.1 * jax.random.normal(k2, (Csq,), dtype=jnp.float32)
    w1 = 0.1 * jax.random.normal(k3, (Ce1, Csq, 1, 1), dtype=jnp.float32)
    b1 = 0.1 * jax.random.normal(k4, (Ce1,), dtype=jnp.float32)
    w3 = 0.1 * jax.random.normal(k5, (Ce3, Csq, 3, 3), dtype=jnp.float32)
    b3 = 0.1 * jax.random.normal(k6, (Ce3,), dtype=jnp.float32)

    out = fire_forward(x, wsq, bsq, w1, b1, w3, b3)
    out = jax.block_until_ready(out)

    ref = _reference_fire(x, wsq, bsq, w1, b1, w3, b3)
    assert out.shape == (N, Ce1 + Ce3, H, W), out.shape
    # bf16 activations/weights on the MXU (f32 accumulate) vs. a pure-f32
    # reference: allow bf16-level tolerance.
    assert jnp.allclose(out, ref, atol=3e-2, rtol=3e-2), \
        float(jnp.max(jnp.abs(out - ref)))

    print("KERNEL_OK")
</pallas_src>

<mosaic_0001>
module attributes {stable_mosaic.version = 11 : i64} {
  func.func @fire_kernel(%arg0: i32, %arg1: memref<1x4x256xbf16, #tpu.memory_space<vmem>>, %arg2: memref<8x4xbf16, #tpu.memory_space<vmem>>, %arg3: memref<8x1xf32, #tpu.memory_space<vmem>>, %arg4: memref<16x72xbf16, #tpu.memory_space<vmem>>, %arg5: memref<16x1xf32, #tpu.memory_space<vmem>>, %arg6: memref<9x256xf32, #tpu.memory_space<vmem>>, %arg7: memref<1x16x256xf32, #tpu.memory_space<vmem>>, %arg8: memref<72x256xbf16, #tpu.memory_space<vmem>>) attributes {dimension_semantics = [#tpu.dimension_semantics<parallel>], iteration_bounds = array<i64: 2>, scalar_prefetch = 0 : i64, scratch_operands = 1 : i64, tpu.core_type = #tpu.core_type<tc>, window_params = [{transform_indices = @transform_0, window_bounds = array<i64: 1, 4, 256>}, {pipeline_mode = #tpu.pipeline_mode<synchronous>, transform_indices = @transform_1, window_bounds = array<i64: 8, 4>}, {pipeline_mode = #tpu.pipeline_mode<synchronous>, transform_indices = @transform_2, window_bounds = array<i64: 8, 1>}, {pipeline_mode = #tpu.pipeline_mode<synchronous>, transform_indices = @transform_3, window_bounds = array<i64: 16, 72>}, {pipeline_mode = #tpu.pipeline_mode<synchronous>, transform_indices = @transform_4, window_bounds = array<i64: 16, 1>}, {pipeline_mode = #tpu.pipeline_mode<synchronous>, transform_indices = @transform_5, window_bounds = array<i64: 9, 256>}, {transform_indices = @transform_6, window_bounds = array<i64: 1, 16, 256>}]} {
    %c0 = arith.constant 0 : index
    %c0_0 = arith.constant 0 : index
    %c0_1 = arith.constant 0 : index
    %0 = vector.load %arg1[%c0, %c0_0, %c0_1] : memref<1x4x256xbf16, #tpu.memory_space<vmem>>, vector<1x4x256xbf16>
    %1 = vector.shape_cast %0 : vector<1x4x256xbf16> to vector<4x256xbf16>
    %c0_2 = arith.constant 0 : index
    %c0_3 = arith.constant 0 : index
    %2 = vector.load %arg2[%c0_2, %c0_3] : memref<8x4xbf16, #tpu.memory_space<vmem>>, vector<8x4xbf16>
    %cst = arith.constant dense<0.000000e+00> : vector<8x256xf32>
    %3 = tpu.matmul %2, %1, %cst {dimension_numbers = #tpu.dot_dimension_numbers<[1], [0], [0], [1], [0, 0, 1, 1], [], []>} : vector<8x4xbf16>, vector<4x256xbf16>, vector<8x256xf32> -> vector<8x256xf32>
    %c0_4 = arith.constant 0 : index
    %c0_5 = arith.constant 0 : index
    %4 = vector.load %arg3[%c0_4, %c0_5] : memref<8x1xf32, #tpu.memory_space<vmem>>, vector<8x1xf32>
    %5 = vector.broadcast %4 : vector<8x1xf32> to vector<8x256xf32>
    %6 = arith.addf %3, %5 : vector<8x256xf32>
    %cst_6 = arith.constant 0.000000e+00 : f32
    %7 = vector.broadcast %cst_6 : f32 to vector<8x256xf32>
    %8 = arith.maximumf %6, %7 : vector<8x256xf32>
    %c17_i32 = arith.constant 17 : i32
    %9 = tpu.dynamic_rotate %8 by %c17_i32 dim 1 : vector<8x256xf32>, i32 -> vector<8x256xf32>
    %c0_7 = arith.constant 0 : index
    %c0_8 = arith.constant 0 : index
    %10 = vector.load %arg6[%c0_7, %c0_8] : memref<9x256xf32, #tpu.memory_space<vmem>>, vector<1x256xf32>
    %11 = vector.broadcast %10 : vector<1x256xf32> to vector<8x256xf32>
    %12 = arith.mulf %9, %11 : vector<8x256xf32>
    %13 = arith.truncf %12 : vector<8x256xf32> to vector<8x256xbf16>
    %c0_9 = arith.constant 0 : index
    %c0_10 = arith.constant 0 : index
    %14 = vector.load %arg8[%c0_9, %c0_10] : memref<72x256xbf16, #tpu.memory_space<vmem>>, vector<8x256xbf16>
    tpu.vector_store %arg8[%c0_9, %c0_10], %13 {strides = array<i32>} : memref<72x256xbf16, #tpu.memory_space<vmem>>, vector<8x256xbf16>,
    %c16_i32 = arith.constant 16 : i32
    %15 = tpu.dynamic_rotate %8 by %c16_i32 dim 1 : vector<8x256xf32>, i32 -> vector<8x256xf32>
    %c1 = arith.constant 1 : index
    %c0_11 = arith.constant 0 : index
    %16 = vector.load %arg6[%c1, %c0_11] : memref<9x256xf32, #tpu.memory_space<vmem>>, vector<1x256xf32>
    %17 = vector.broadcast %16 : vector<1x256xf32> to vector<8x256xf32>
    %18 = arith.mulf %15, %17 : vector<8x256xf32>
    %19 = arith.truncf %18 : vector<8x256xf32> to vector<8x256xbf16>
    %c8 = arith.constant 8 : index
    %c0_12 = arith.constant 0 : index
    %20 = vector.load %arg8[%c8, %c0_12] : memref<72x256xbf16, #tpu.memory_space<vmem>>, vector<8x256xbf16>
    tpu.vector_store %arg8[%c8, %c0_12], %19 {strides = array<i32>} : memref<72x256xbf16, #tpu.memory_space<vmem>>, vector<8x256xbf16>,
    %c15_i32 = arith.constant 15 : i32
    %21 = tpu.dynamic_rotate %8 by %c15_i32 dim 1 : vector<8x256xf32>, i32 -> vector<8x256xf32>
    %c2 = arith.constant 2 : index
    %c0_13 = arith.constant 0 : index
    %22 = vector.load %arg6[%c2, %c0_13] : memref<9x256xf32, #tpu.memory_space<vmem>>, vector<1x256xf32>
    %23 = vector.broadcast %22 : vector<1x256xf32> to vector<8x256xf32>
    %24 = arith.mulf %21, %23 : vector<8x256xf32>
    %25 = arith.truncf %24 : vector<8x256xf32> to vector<8x256xbf16>
    %c16 = arith.constant 16 : index
    %c0_14 = arith.constant 0 : index
    %26 = vector.load %arg8[%c16, %c0_14] : memref<72x256xbf16, #tpu.memory_space<vmem>>, vector<8x256xbf16>
    tpu.vector_store %arg8[%c16, %c0_14], %25 {strides = array<i32>} : memref<72x256xbf16, #tpu.memory_space<vmem>>, vector<8x256xbf16>,
    %c1_i32 = arith.constant 1 : i32
    %27 = tpu.dynamic_rotate %8 by %c1_i32 dim 1 : vector<8x256xf32>, i32 -> vector<8x256xf32>
    %c3 = arith.constant 3 : index
    %c0_15 = arith.constant 0 : index
    %28 = vector.load %arg6[%c3, %c0_15] : memref<9x256xf32, #tpu.memory_space<vmem>>, vector<1x256xf32>
    %29 = vector.broadcast %28 : vector<1x256xf32> to vector<8x256xf32>
    %30 = arith.mulf %27, %29 : vector<8x256xf32>
    %31 = arith.truncf %30 : vector<8x256xf32> to vector<8x256xbf16>
    %c24 = arith.constant 24 : index
    %c0_16 = arith.constant 0 : index
    %32 = vector.load %arg8[%c24, %c0_16] : memref<72x256xbf16, #tpu.memory_space<vmem>>, vector<8x256xbf16>
    tpu.vector_store %arg8[%c24, %c0_16], %31 {strides = array<i32>} : memref<72x256xbf16, #tpu.memory_space<vmem>>, vector<8x256xbf16>,
    %33 = arith.truncf %8 : vector<8x256xf32> to vector<8x256xbf16>
    %c32 = arith.constant 32 : index
    %c0_17 = arith.constant 0 : index
    %34 = vector.load %arg8[%c32, %c0_17] : memref<72x256xbf16, #tpu.memory_space<vmem>>, vector<8x256xbf16>
    tpu.vector_store %arg8[%c32, %c0_17], %33 {strides = array<i32>} : memref<72x256xbf16, #tpu.memory_space<vmem>>, vector<8x256xbf16>,
    %c255_i32 = arith.constant 255 : i32
    %35 = tpu.dynamic_rotate %8 by %c255_i32 dim 1 : vector<8x256xf32>, i32 -> vector<8x256xf32>
    %c5 = arith.constant 5 : index
    %c0_18 = arith.constant 0 : index
    %36 = vector.load %arg6[%c5, %c0_18] : memref<9x256xf32, #tpu.memory_space<vmem>>, vector<1x256xf32>
    %37 = vector.broadcast %36 : vector<1x256xf32> to vector<8x256xf32>
    %38 = arith.mulf %35, %37 : vector<8x256xf32>
    %39 = arith.truncf %38 : vector<8x256xf32> to vector<8x256xbf16>
    %c40 = arith.constant 40 : index
    %c0_19 = arith.constant 0 : index
    %40 = vector.load %arg8[%c40, %c0_19] : memref<72x256xbf16, #tpu.memory_space<vmem>>, vector<8x256xbf16>
    tpu.vector_store %arg8[%c40, %c0_19], %39 {strides = array<i32>} : memref<72x256xbf16, #tpu.memory_space<vmem>>, vector<8x256xbf16>,
    %c241_i32 = arith.constant 241 : i32
    %41 = tpu.dynamic_rotate %8 by %c241_i32 dim 1 : vector<8x256xf32>, i32 -> vector<8x256xf32>
    %c6 = arith.constant 6 : index
    %c0_20 = arith.constant 0 : index
    %42 = vector.load %arg6[%c6, %c0_20] : memref<9x256xf32, #tpu.memory_space<vmem>>, vector<1x256xf32>
    %43 = vector.broadcast %42 : vector<1x256xf32> to vector<8x256xf32>
    %44 = arith.mulf %41, %43 : vector<8x256xf32>
    %45 = arith.truncf %44 : vector<8x256xf32> to vector<8x256xbf16>
    %c48 = arith.constant 48 : index
    %c0_21 = arith.constant 0 : index
    %46 = vector.load %arg8[%c48, %c0_21] : memref<72x256xbf16, #tpu.memory_space<vmem>>, vector<8x256xbf16>
    tpu.vector_store %arg8[%c48, %c0_21], %45 {strides = array<i32>} : memref<72x256xbf16, #tpu.memory_space<vmem>>, vector<8x256xbf16>,
    %c240_i32 = arith.constant 240 : i32
    %47 = tpu.dynamic_rotate %8 by %c240_i32 dim 1 : vector<8x256xf32>, i32 -> vector<8x256xf32>
    %c7 = arith.constant 7 : index
    %c0_22 = arith.constant 0 : index
    %48 = vector.load %arg6[%c7, %c0_22] : memref<9x256xf32, #tpu.memory_space<vmem>>, vector<1x256xf32>
    %49 = vector.broadcast %48 : vector<1x256xf32> to vector<8x256xf32>
    %50 = arith.mulf %47, %49 : vector<8x256xf32>
    %51 = arith.truncf %50 : vector<8x256xf32> to vector<8x256xbf16>
    %c56 = arith.constant 56 : index
    %c0_23 = arith.constant 0 : index
    %52 = vector.load %arg8[%c56, %c0_23] : memref<72x256xbf16, #tpu.memory_space<vmem>>, vector<8x256xbf16>
    tpu.vector_store %arg8[%c56, %c0_23], %51 {strides = array<i32>} : memref<72x256xbf16, #tpu.memory_space<vmem>>, vector<8x256xbf16>,
    %c239_i32 = arith.constant 239 : i32
    %53 = tpu.dynamic_rotate %8 by %c239_i32 dim 1 : vector<8x256xf32>, i32 -> vector<8x256xf32>
    %c8_24 = arith.constant 8 : index
    %c0_25 = arith.constant 0 : index
    %54 = vector.load %arg6[%c8_24, %c0_25] : memref<9x256xf32, #tpu.memory_space<vmem>>, vector<1x256xf32>
    %55 = vector.broadcast %54 : vector<1x256xf32> to vector<8x256xf32>
    %56 = arith.mulf %53, %55 : vector<8x256xf32>
    %57 = arith.truncf %56 : vector<8x256xf32> to vector<8x256xbf16>
    %c64 = arith.constant 64 : index
    %c0_26 = arith.constant 0 : index
    %58 = vector.load %arg8[%c64, %c0_26] : memref<72x256xbf16, #tpu.memory_space<vmem>>, vector<8x256xbf16>
    tpu.vector_store %arg8[%c64, %c0_26], %57 {strides = array<i32>} : memref<72x256xbf16, #tpu.memory_space<vmem>>, vector<8x256xbf16>,
    %c0_27 = arith.constant 0 : index
    %c0_28 = arith.constant 0 : index
    %59 = vector.load %arg4[%c0_27, %c0_28] : memref<16x72xbf16, #tpu.memory_space<vmem>>, vector<16x72xbf16>
    %c0_29 = arith.constant 0 : index
    %c0_30 = arith.constant 0 : index
    %60 = vector.load %arg8[%c0_29, %c0_30] : memref<72x256xbf16, #tpu.memory_space<vmem>>, vector<72x256xbf16>
    %cst_31 = arith.constant dense<0.000000e+00> : vector<16x256xf32>
    %61 = tpu.matmul %59, %60, %cst_31 {dimension_numbers = #tpu.dot_dimension_numbers<[1], [0], [0], [1], [0, 0, 1, 1], [], []>} : vector<16x72xbf16>, vector<72x256xbf16>, vector<16x256xf32> -> vector<16x256xf32>
    %c0_32 = arith.constant 0 : index
    %c0_33 = arith.constant 0 : index
    %62 = vector.load %arg5[%c0_32, %c0_33] : memref<16x1xf32, #tpu.memory_space<vmem>>, vector<16x1xf32>
    %63 = vector.broadcast %62 : vector<16x1xf32> to vector<16x256xf32>
    %64 = arith.addf %61, %63 : vector<16x256xf32>
    %cst_34 = arith.constant 0.000000e+00 : f32
    %65 = vector.broadcast %cst_34 : f32 to vector<16x256xf32>
    %66 = arith.maximumf %64, %65 : vector<16x256xf32>
    %c0_35 = arith.constant 0 : index
    %c0_36 = arith.constant 0 : index
    %c0_37 = arith.constant 0 : index
    %67 = vector.load %arg7[%c0_35, %c0_36, %c0_37] : memref<1x16x256xf32, #tpu.memory_space<vmem>>, vector<1x16x256xf32>
    %68 = vector.shape_cast %67 : vector<1x16x256xf32> to vector<16x256xf32>
    %69 = vector.shape_cast %66 : vector<16x256xf32> to vector<1x16x256xf32>
    tpu.vector_store %arg7[%c0_35, %c0_36, %c0_37], %69 {strides = array<i32>} : memref<1x16x256xf32, #tpu.memory_space<vmem>>, vector<1x16x256xf32>,
    return
  }
  func.func @transform_0(%arg0: i32) -> (i32, i32, i32) {
    %c0_i32 = arith.constant 0 : i32
    %c0_i32_0 = arith.constant 0 : i32
    %c0_i32_1 = arith.constant 0 : i32
    return %arg0, %c0_i32, %c0_i32_0 : i32, i32, i32
  }
  func.func @transform_1(%arg0: i32) -> (i32, i32) {
    %c0_i32 = arith.constant 0 : i32
    %c0_i32_0 = arith.constant 0 : i32
    %c0_i32_1 = arith.constant 0 : i32
    return %c0_i32, %c0_i32_0 : i32, i32
  }
  func.func @transform_2(%arg0: i32) -> (i32, i32) {
    %c0_i32 = arith.constant 0 : i32
    %c0_i32_0 = arith.constant 0 : i32
    %c0_i32_1 = arith.constant 0 : i32
    return %c0_i32, %c0_i32_0 : i32, i32
  }
  func.func @transform_3(%arg0: i32) -> (i32, i32) {
    %c0_i32 = arith.constant 0 : i32
    %c0_i32_0 = arith.constant 0 : i32
    %c0_i32_1 = arith.constant 0 : i32
    return %c0_i32, %c0_i32_0 : i32, i32
  }
  func.func @transform_4(%arg0: i32) -> (i32, i32) {
    %c0_i32 = arith.constant 0 : i32
    %c0_i32_0 = arith.constant 0 : i32
    %c0_i32_1 = arith.constant 0 : i32
    return %c0_i32, %c0_i32_0 : i32, i32
  }
  func.func @transform_5(%arg0: i32) -> (i32, i32) {
    %c0_i32 = arith.constant 0 : i32
    %c0_i32_0 = arith.constant 0 : i32
    %c0_i32_1 = arith.constant 0 : i32
    return %c0_i32, %c0_i32_0 : i32, i32
  }
  func.func @transform_6(%arg0: i32) -> (i32, i32, i32) {
    %c0_i32 = arith.constant 0 : i32
    %c0_i32_0 = arith.constant 0 : i32
    %c0_i32_1 = arith.constant 0 : i32
    return %arg0, %c0_i32, %c0_i32_0 : i32, i32, i32
  }
}

</mosaic_0001>

<bundles_post_ra>
// kernel: tpu_custom_call.1
= control target key start
LH: loop header
LB: loop body
LE: loop exit
PB: predicated region body
PF: predicated region fallthrough
CT: control target
= control target key end

     0   :  { %11 = vsyncpa [#allocation4], 0  ;;  %s1322_s0 = inlined_call_operand.vmem [shape: bf16[2,4,256], index: 0, kind: input, shape index: {}]   ;;  %s1323_s1 = inlined_call_operand.vmem [shape: bf16[8,4], index: 1, kind: input, shape index: {}]   ;;  %s1324_s2 = inlined_call_operand.vmem [shape: f32[8,1], index: 2, kind: input, shape index: {}]   ;;  %s1325_s3 = inlined_call_operand.hbm [shape: bf16[16,72], index: 3, kind: input, shape index: {}]   ;;  %s1326_s4 = inlined_call_operand.vmem [shape: f32[16,1], index: 4, kind: input, shape index: {}]   ;;  %s1327_s5 = inlined_call_operand.vmem [shape: f32[9,256], index: 5, kind: input, shape index: {}]   ;;  %s1328_s6 = inlined_call_operand.hbm [shape: f32[2,16,256], index: 6, kind: output, shape index: {}]  }
   0x1   :  { %12 = vsyncpa [#allocation5], 0 }
   0x2   :  { %14 = vsyncpa [#allocation5 + $0x1], 0  ;;  %s1091_s21 = smov 0   ;;  %s1093_s22 = smov 0  }
   0x3   :  { %s1095_s23 = smov 0   ;;  %s1097_s24 = smov 0  }
   0x4 LB: > { %s1112_s25 = sadd.s32 4294967295, %s1040_s24   ;;  %s818_s26 = sadd.s32 4294967294, %s1040_s24   ;;  %s1040_s24 = sphi %s1097_s24, %s1336_s24   ;;  %s1036_s23 = sphi %s1095_s23, %s1335_s23   ;;  %s1032_s22 = sphi %s1093_s22, %s1334_s22   ;;  %s1028_s21 = sphi %s1091_s21, %s1333_s21  }
   0x5   : > { %s1116_s27 = sadd.s32 1, %s1040_s24   ;;  %s158_s28 = sadd.s32 1, %s1036_s23 }
   0x6   : > { %s155_s29 = ssub.s32 %s1040_s24, %s1116_s27  ;;  %p168_p0 = scmp.ne.s32.totalorder %s1036_s23, %s1032_s22 }
   0x7   : > { %p156_p1 = scmp.eq.s32.totalorder %s155_s29, 0  ;;  %p169_p2 = scmp.eq.s32.totalorder %s1112_s25, 1 }
   0x8   : > { %p174_p3 = scmp.ne.s32.totalorder %s1032_s22, %s1028_s21  ;;  %p175_p4 = scmp.eq.s32.totalorder %s818_s26, 1 }
   0x9   : > { %s1127_s30 = scalar_select %p156_p1, %s1036_s23, %s158_s28  }
   0xa   : > { %p1129_p5 = por %p169_p2, %p168_p0  ;;  %p1133_p6 = por %p175_p4, %p174_p3 }
   0xb   : > { %p819_p7 = scmp.ge.s32.totalorder %s1040_s24, 1  ;;  %p182_p8 = scmp.lt.s32.totalorder %s1040_s24, 3 }
   0xc   : > { %s1330_s8 = scalar_select %p1133_p6, 1, 0 }
   0xd   : > { %p899_p9 = scmp.eq.s32.totalorder %s1112_s25, 0  ;;  %p1140_p10 = pnand %p819_p7, %p182_p8 }
   0xe   : > { %s1042_s10 = smov [#allocation3]  }
   0xf   : > { %s200_s11 = sshll.u32 %s1042_s10, 4  ;;  %p891_p11 = pneg %p1140_p10  ;;  %s201_s11 = int_to_ptr.vmem [resolvable:$true] %s200_s11 }
  0x10   : > { %s961_s12 = scalar_lea.vmem %s201_s11, 128  ;;  %p969_p3 = scmp.lt.s32.totalorder %s201_s11, %s201_s11 }
  0x11   : > { %p892_p12 = pnand %p899_p9, %p891_p11  ;;  %p962_p0 = scmp.ne.s32.totalorder %s201_s11, %s961_s12 }
  0x12   : > { %p970_p4 = scmp.lt.s32.totalorder %s961_s12, %s961_s12 }
  0x13   : > { %p952_p13 = pneg %p892_p12 }
  0x14   : > { %p971_p6 = por %p970_p4, %p969_p3 }
  0x15   : > { %p964_p1 = pnand %p962_p0, %p952_p13 }
  0x17   : > { %p965_p2 = pneg %p964_p1 }
  0x19   : > { %p972_p7 = pnand %p971_p6, %p965_p2 }
  0x1b   : > { %975 = shalt.err (!%p972_p7)
}
  0x1c   : > { %s1043_s13 = smov 64   ;;  %s1044_s14 = smov 4  }
  0x1d   : > { %894 = dma.hbm_to_vmem [thread:$0]  (!%p892_p12), %s1325_s3, 128, %s201_s11, [#allocation4], %s1043_s13, %s1043_s13, %s1044_s14  }
  0x1e   : > { %230 = sbr.rel (%p1140_p10) target bundleno = 615 (0x267), region = 44 }
  0x23   : > { %1019 = dma.done.wait (%p899_p9), [#allocation4], 128  }
  0x24   : > { %1021 = vsyncadd (%p899_p9), [#allocation4], 4294967168  ;;  %p260_p8 = scmp.lt.s32.totalorder %s1112_s25, 1  ;;  %v1045_v0 = vmov 0   ;;  %vm287_vm0 = vcmask 1041408   ;;  %v268_v4 = vld [vmem:[%s1324_s2] sm:$0xff]  ;;  %v341_v19 = vlaneseq }
  0x25   : > { %326 = vmatprep.mubr.bf16.mxu0 %v1045_v0  ;;  %947 = vset.pattern.permute.xlu0 %v1045_v0  ;;  %v267_v5 = vld [vmem:[%s1323_s1] sm:$0xf]  ;;  %vm283_vm1 = vcmask 31744   ;;  %s1046_s11 = smov 113   ;;  %s1047_s12 = smov 111   ;;  %v607_v15 = vld [vmem:[%s1326_s4 + $0x8] sm:$0xff] }
  0x26   : > { %s261_s17 = scalar_select %p260_p8, %s1112_s25, 1  ;;  %711 = vmatprep.mubr.bf16.mxu1 %v1045_v0  ;;  %948 = vset.pattern.permute.xlu1 %v1045_v0  ;;  %v606_v16 = vld [vmem:[%s1326_s4] sm:$0xff]  ;;  %v349_v21 = vshrl.u32 %v341_v19, 7  ;;  %v1196_v23 = vand.u32 127, %v341_v19  ;;  %vm672_vm6 = vcmask 1043456   ;;  %vm668_vm11 = vcmask 588800  }
  0x27   : > { %271 = vperm.xlu0 %947, %v268_v4   ;;  %s1048_s13 = smov 112   ;;  %s1049_s14 = smov 127   ;;  %v842_v24 = vld [vmem:[%s1327_s5 + $0x7] ss:$8 sm:$0x3] }
  0x28   : > { %s864_s18 = sshll.u32 %s261_s17, 2  ;;  %s1050_s15 = smov 15   ;;  %v844_v25 = vld [vmem:[%s1327_s5 + $0x10] ss:$8 sm:$0x3]  ;;  %v1204_v26 = vsub.s32 0, %v349_v21 }
  0x29   : > { %s264_s26 = scalar_lea.vmem %s1322_s0, %s864_s18  ;;  %s1051_s16 = smov 1   ;;  %v1206_v27 = vsub.s32 1, %v349_v21  ;;  %vm537_vm2 = vcmp.lt.s32.totalorder %v1196_v23, 112  ;;  %vm506_vm3 = vcmp.lt.s32.totalorder %v1196_v23, 113  ;;  %vm568_vm4 = vcmp.lt.s32.totalorder %v1196_v23, 111 }
  0x2a   : > { %v827_v1 = vld.sshfl [vmem:[%s264_s26] sm:$0x33 pattern:$0x76325410]  ;;  %s1052_s17 = smov 17   ;;  %s1053_s18 = smov 16   ;;  %v577_v32 = vrot.slane %v844_v25, %v1204_v26  ;;  %v546_v37 = vrot.slane %v842_v24, %v1204_v26 }
  0x2b   : > { %v282_v2 = vcombine.high %v827_v1, %v827_v1  ;;  %v289_v3 = vsel %vm287_vm0, %v827_v1, 0  ;;  %v840_v30 = vld [vmem:[%s1327_s5 + $0x6] ss:$8 sm:$0x3]  ;;  %v550_v31 = vrot.slane %v842_v24, %v1206_v27  ;;  %v581_v34 = vrot.slane %v844_v25, %v1206_v27  ;;  %s257_s10 = sand.u32 1, %s1032_s22  }
  0x2c   : > { %v838_v33 = vld [vmem:[%s1327_s5 + $0x5] ss:$8 sm:$0x3]  ;;  %v519_v36 = vrot.slane %v840_v30, %v1206_v27  ;;  %vm475_vm5 = vcmp.lt.s32.totalorder %v1196_v23, 127  ;;  %v515_v49 = vrot.slane %v840_v30, %v1204_v26  ;;  %vm404_vm7 = vcmp.lt.s32.totalorder %v1196_v23, 15  ;;  %s1281_s19 = scalar_lea.sflag [#allocation5], %s257_s10 }
  0x2d   : > { %828 = vmatprep.subr.msk.bf16.mxu0 %vm287_vm0, %v282_v2  ;;  %v488_v43 = vrot.slane %v838_v33, %v1206_v27  ;;  %v835_v48 = vld [vmem:[%s1327_s5 + $0x3] ss:$8 sm:$0x3]  ;;  %v484_v50 = vrot.slane %v838_v33, %v1204_v26  ;;  %v833_v59 = vld [vmem:[%s1327_s5 + $0x2] ss:$8 sm:$0x3] }
  0x2e   : > { %309 = vmatpush1.bf16.msra.mxu0 %v289_v3  ;;  %vm435_vm8 = vcmp.lt.s32.totalorder %v1196_v23, 1  ;;  %v448_v60 = vrot.slane %v835_v48, %v1206_v27  ;;  %v417_v2 = vrot.slane %v833_v59, %v1206_v27  ;;  %v444_v4 = vrot.slane %v835_v48, %v1204_v26 }
  0x2f   : > { %vm343_vm9 = vcmp.lt.s32.totalorder %v1196_v23, 17  ;;  %vm373_vm10 = vcmp.lt.s32.totalorder %v1196_v23, 16 }
  0x31   : > { %829 = vmatmul.mubr.msk.bf16.vlgmr.msra.gmra.mxu0 %vm283_vm1, %v267_v5 }
  0xa2   : > { %v272_v6 = vpop.permute.xlu0 %271 }
  0xf1   : > { %v328_v7 = vpop.f32.mrf.mxu0 }
  0xf2   : > { %v329_v8 = vadd.f32 %v328_v7, %v272_v6 }
  0xf3   : > { %v330_v9 = vpop.f32.mrf.mxu0 }
  0xf4   : > { %v1168_v10 = vmax.f32 %v329_v8, 0.0  ;;  %v331_v11 = vadd.f32 %v330_v9, %v272_v6 }
  0xf5   : > { %v332_v12 = vpop.f32.mrf.mxu0 }
  0xf6   : > { %502 = vrot.lane.b32.xlu1 %v1168_v10, %s1046_s11  ;;  %564 = vrot.lane.b32.xlu0 %v1168_v10, %s1047_s12  ;;  %v1172_v14 = vmax.f32 %v331_v11, 0.0 }
  0xf7   : > { %v333_v13 = vpop.f32.mrf.mxu0 }
  0xfa   : > { %533 = vrot.lane.b32.xlu1 %v1168_v10, %s1048_s13  ;;  %504 = vrot.lane.b32.xlu0 %v1172_v14, %s1046_s11  ;;  %s824_s11 = sshll.u32 %s257_s10, 5 }
  0xfe   : > { %471 = vrot.lane.b32.xlu1 %v1168_v10, %s1049_s14  ;;  %535 = vrot.lane.b32.xlu0 %v1172_v14, %s1048_s13 }
 0x102   : > { %566 = vrot.lane.b32.xlu1 %v1172_v14, %s1047_s12  ;;  %473 = vrot.lane.b32.xlu0 %v1172_v14, %s1049_s14  ;;  %s259_s12 = scalar_lea.vmem [#allocation6], %s824_s11  ;;  %s874_s14 = sshll.u32 %s1112_s25, 9 }
 0x103   : > { %s744_s13 = sshll.u32 %s259_s12, 4  ;;  %s1054_s25 = smov [#allocation6]   ;;  %s1274_s13 = int_to_ptr.vmem [resolvable:$true] %s744_s13 }
 0x104   : > { %s976_s20 = scalar_lea.vmem %s1274_s13, 512  ;;  %s980_s26 = sshll.u32 %s1054_s25, 4  ;;  %s981_s26 = int_to_ptr.vmem [resolvable:$false] %s980_s26 }
 0x105   : > { %p977_p6 = scmp.ne.s32.totalorder %s1274_s13, %s976_s20  ;;  %s982_s28 = scalar_lea.vmem %s981_s26, 1024 }
 0x106   : > { %400 = vrot.lane.b32.xlu1 %v1168_v10, %s1050_s15  ;;  %402 = vrot.lane.b32.xlu0 %v1172_v14, %s1050_s15  ;;  %p983_p11 = scmp.lt.s32.totalorder %s1274_s13, %s981_s26  ;;  %p984_p12 = scmp.lt.s32.totalorder %s982_s28, %s976_s20 }
 0x107   : > { %p978_p9 = pnand %p977_p6, %p1129_p5 }
 0x108   : > { %p985_p13 = por %p984_p12, %p983_p11 }
 0x109   : > { %p979_p10 = pneg %p978_p9 }
 0x10a   : > { %431 = vrot.lane.b32.xlu1 %v1168_v10, %s1051_s16  ;;  %433 = vrot.lane.b32.xlu0 %v1172_v14, %s1051_s16 }
 0x10b   : > { %p986_p0 = pnand %p985_p13, %p979_p10 }
 0x10e   : > { %337 = vrot.lane.b32.xlu1 %v1168_v10, %s1052_s17  ;;  %339 = vrot.lane.b32.xlu0 %v1172_v14, %s1052_s17  ;;  %s1279_s17 = scalar_lea.hbm %s1328_s6, %s874_s14 }
 0x112   : > { %369 = vrot.lane.b32.xlu1 %v1168_v10, %s1053_s18  ;;  %371 = vrot.lane.b32.xlu0 %v1172_v14, %s1053_s18 }
 0x116   : > { %615 = vperm.xlu0 %947, %v607_v15   ;;  %610 = vperm.xlu1 %948, %v606_v16   ;;  %v346_v15 = vld [vmem:[%s1327_s5] ss:$8 sm:$0x3]  ;;  %v413_v16 = vrot.slane %v833_v59, %v1204_v26 }
 0x117   : > { %v355_v24 = vrot.slane %v346_v15, %v1206_v27 }
 0x168   : > { %v503_v17 = vpop.permute.xlu1 %502  ;;  %v565_v18 = vpop.permute.xlu0 %564 }
 0x16c   : > { %v534_v20 = vpop.permute.xlu1 %533  ;;  %v505_v22 = vpop.permute.xlu0 %504 }
 0x16d   : > { %v508_v40 = vsel %vm506_vm3, %v505_v22, %v503_v17  ;;  %v507_v52 = vsel %vm506_vm3, %v503_v17, %v505_v22  ;;  %v831_v17 = vld [vmem:[%s1327_s5 + $0x1] ss:$8 sm:$0x3]  ;;  %v351_v22 = vrot.slane %v346_v15, %v1204_v26 }
 0x16e   : > { %v523_v53 = vmul.f32 %v519_v36, %v508_v40  ;;  %v522_v1 = vmul.f32 %v515_v49, %v507_v52  ;;  %v386_v30 = vrot.slane %v831_v17, %v1206_v27  ;;  %v949_v27 = vld [vmem:[#allocation3] sm:$0xff]  }
 0x170   : > { %v472_v28 = vpop.permute.xlu1 %471  ;;  %v536_v29 = vpop.permute.xlu0 %535 }
 0x171   : > { %v539_v35 = vsel %vm537_vm2, %v536_v29, %v534_v20  ;;  %v538_v44 = vsel %vm537_vm2, %v534_v20, %v536_v29  ;;  %v382_v29 = vrot.slane %v831_v17, %v1204_v26 }
 0x172   : > { %v554_v45 = vmul.f32 %v550_v31, %v539_v35  ;;  %v553_v58 = vmul.f32 %v546_v37, %v538_v44 }
 0x174   : > { %v567_v38 = vpop.permute.xlu1 %566  ;;  %v474_v39 = vpop.permute.xlu0 %473  ;;  %v882_v0 = vpack.c.bf16 %v554_v45, %v523_v53  ;;  %v881_v9 = vpack.c.bf16 %v553_v58, %v522_v1 }
 0x175   : > { %v569_v41 = vsel %vm568_vm4, %v565_v18, %v567_v38  ;;  %v570_v42 = vsel %vm568_vm4, %v567_v38, %v565_v18  ;;  %v477_v51 = vsel %vm475_vm5, %v474_v39, %v472_v28  ;;  %v476_v61 = vsel %vm475_vm5, %v472_v28, %v474_v39 }
 0x176   : > { %v584_v46 = vmul.f32 %v577_v32, %v569_v41  ;;  %v585_v47 = vmul.f32 %v581_v34, %v570_v42  ;;  %v492_v62 = vmul.f32 %v488_v43, %v477_v51  ;;  %v491_v6 = vmul.f32 %v484_v50, %v476_v61 }
 0x178   : > { %v401_v54 = vpop.permute.xlu1 %400  ;;  %v403_v55 = vpop.permute.xlu0 %402  ;;  %v884_v56 = vpack.c.bf16 %v585_v47, %v585_v47  ;;  %v883_v57 = vpack.c.bf16 %v584_v46, %v584_v46  ;;  %v880_v13 = vpack.c.bf16 %v492_v62, %v1172_v14  ;;  %v879_v25 = vpack.c.bf16 %v491_v6, %v1168_v10 }
 0x179   : > { %v405_v7 = vsel %vm404_vm7, %v401_v54, %v403_v55  ;;  %v406_v18 = vsel %vm404_vm7, %v403_v55, %v401_v54 }
 0x17a   : > { %857 = vmatprep.subr.msk.bf16.mxu1 %vm672_vm6, %v884_v56  ;;  %v674_v63 = vsel %vm672_vm6, %v883_v57, 0  ;;  %v421_v19 = vmul.f32 %v417_v2, %v405_v7  ;;  %v420_v31 = vmul.f32 %v413_v16, %v406_v18 }
 0x17b   : > { %686 = vmatpush1.bf16.msra.mxu1 %v674_v63 }
 0x17c   : > { %v432_v3 = vpop.permute.xlu1 %431  ;;  %687 = vmatprep.subr.bf16.mxu1 %v882_v0  ;;  %v434_v5 = vpop.permute.xlu0 %433 }
 0x17d   : > { %v436_v8 = vsel %vm435_vm8, %v432_v3, %v434_v5  ;;  %v437_v11 = vsel %vm435_vm8, %v434_v5, %v432_v3 }
 0x17e   : > { %v452_v12 = vmul.f32 %v448_v60, %v436_v8  ;;  %v451_v21 = vmul.f32 %v444_v4, %v437_v11 }
 0x17f   : > { %688 = vmatpush1.bf16.msra.mxu1 %v881_v9 }
 0x180   : > { %v338_v20 = vpop.permute.xlu1 %337  ;;  %689 = vmatprep.subr.bf16.mxu1 %v880_v13  ;;  %v340_v14 = vpop.permute.xlu0 %339  ;;  %v878_v28 = vpack.c.bf16 %v452_v12, %v421_v19  ;;  %v877_v38 = vpack.c.bf16 %v451_v21, %v420_v31 }
 0x181   : > { %v344_v32 = vsel %vm343_vm9, %v338_v20, %v340_v14  ;;  %v345_v33 = vsel %vm343_vm9, %v340_v14, %v338_v20 }
 0x182   : > { %v358_v39 = vmul.f32 %v351_v22, %v345_v33  ;;  %v359_v10 = vmul.f32 %v355_v24, %v344_v32 }
 0x183   : > { %690 = vmatpush1.bf16.msra.mxu1 %v879_v25 }
 0x184   : > { %v370_v34 = vpop.permute.xlu1 %369  ;;  %691 = vmatprep.subr.bf16.mxu1 %v878_v28  ;;  %v372_v35 = vpop.permute.xlu0 %371 }
 0x185   : > { %v374_v36 = vsel %vm373_vm10, %v370_v34, %v372_v35  ;;  %v375_v37 = vsel %vm373_vm10, %v372_v35, %v370_v34 }
 0x186   : > { %v389_v40 = vmul.f32 %v382_v29, %v375_v37  ;;  %v390_v41 = vmul.f32 %v386_v30, %v374_v36 }
 0x187   : > { %692 = vmatpush1.bf16.msra.mxu1 %v877_v38 }
 0x188   : > { %v876_v23 = vpack.c.bf16 %v390_v41, %v359_v10  ;;  %v875_v26 = vpack.c.bf16 %v389_v40, %v358_v39 }
 0x18a   : > { %693 = vmatprep.subr.bf16.mxu1 %v876_v23 }
 0x18b   : > { %694 = vmatpush1.bf16.msra.mxu1 %v875_v26 }
 0x18e   : > { %858 = vmatmul.mubr.msk.bf16.vlgmr.msra.gmra.mxu1 %vm668_vm11, %v949_v27 }
 0x191   : > { %v611_v42 = vpop.permute.xlu1 %610  ;;  %v616_v48 = vpop.permute.xlu0 %615 }
 0x24e   : > { %v713_v43 = vpop.f32.mrf.mxu1 }
 0x24f   : > { %v714_v44 = vadd.f32 %v713_v43, %v611_v42 }
 0x250   : > { %v715_v45 = vpop.f32.mrf.mxu1 }
 0x251   : > { %v722_v46 = vmax.f32 %v714_v44, 0.0  ;;  %v716_v47 = vadd.f32 %v715_v45, %v611_v42 }
 0x252   : > { %v717_v49 = vpop.f32.mrf.mxu1 }
 0x253   : > { %726 = vst [vmem:[%s259_s12] sm:$0xff] %v722_v46  ;;  %v723_v50 = vmax.f32 %v716_v47, 0.0  ;;  %v718_v51 = vadd.f32 %v717_v49, %v616_v48 }
 0x254   : > { %v719_v52 = vpop.f32.mrf.mxu1 }
 0x255   : > { %727 = vst [vmem:[%s259_s12 + $0x8] sm:$0xff] %v723_v50  ;;  %v724_v53 = vmax.f32 %v718_v51, 0.0  ;;  %v720_v54 = vadd.f32 %v719_v52, %v616_v48 }
 0x257   : > { %728 = vst [vmem:[%s259_s12 + $0x10] sm:$0xff] %v724_v53  ;;  %v725_v55 = vmax.f32 %v720_v54, 0.0 }
 0x259   : > { %729 = vst [vmem:[%s259_s12 + $0x18] sm:$0xff] %v725_v55 }
 0x25a   : > { %989 = shalt.err (!%p986_p0)
}
 0x25b   : > { %s990_s29 = scalar_lea.hbm %s1279_s17, 512  ;;  %s994_s11 = scalar_lea.hbm %s1328_s6, 1024 }
 0x25c   : > { %p991_p1 = scmp.ne.s32.totalorder %s1279_s17, %s990_s29  ;;  %p995_p4 = scmp.lt.s32.totalorder %s1279_s17, %s1328_s6 }
 0x25d   : > { %p996_p7 = scmp.lt.s32.totalorder %s994_s11, %s990_s29 }
 0x25e   : > { %p992_p2 = pnand %p991_p1, %p1129_p5 }
 0x25f   : > { %p997_p8 = por %p996_p7, %p995_p4 }
 0x260   : > { %p993_p3 = pneg %p992_p2 }
 0x262   : > { %p998_p6 = pnand %p997_p8, %p993_p3 }
 0x264   : > { %1001 = shalt.err (!%p998_p6)
}
 0x265   : > { %s1055_s15 = smov 256  }
 0x266   : > { %889 = dma.vmem_to_hbm [thread:$0]  (%p1129_p5), %s1274_s13, 512, %s1279_s17, %s1281_s19, %s1055_s15, %s1055_s15, %s1053_s18  }
 0x267 PF: > { %p901_p9 = scmp.ge.s32.totalorder %s1040_s24, 2  ;;  %s759_s16 = sand.u32 1, %s1028_s21  }
 0x268   : > { %p1332_p10 = scmp.ne.s32.totalorder %s1330_s8, 0  ;;  %s760_s20 = scalar_lea.sflag [#allocation5], %s759_s16 }
 0x26a   : > { %p896_p11 = pnand %p901_p9, %p1332_p10 }
 0x26c   : > { %p897_p12 = pneg %p896_p11 }
 0x26e   : > { %1023 = dma.done.wait (%p897_p12), %s760_s20, 512  }
 0x26f   : > { %1025 = vsyncadd (%p897_p12), %s760_s20, 4294966784  ;;  %p17_p13 = scmp.ge.s32.totalorder %s1116_s27, 4   ;;  %s1333_s21 = smov %s1032_s22 }
 0x270   : > { %s1334_s22 = smov %s1036_s23  ;;  %s1335_s23 = smov %s1127_s30 }
 0x271   : > { %s1336_s24 = smov %s1116_s27  ;;  %19 = sbr.rel (!%p17_p13) target bundleno = 4 (0x4), region = 91 }
 0x276   :  { %765 = vsyncpa [#allocation4], 1 }
 0x277   :  { %767 = vsyncpa [#allocation4 + $0x1], 1 }
 0x278   :  { %768 = vsyncpa [#allocation5], 1 }
 0x279   :  { %770 = vsyncpa [#allocation5 + $0x1], 1 }

</bundles_post_ra>
